<compile_context>
chip_gen: v5e
topology: v5e:2x2
jax: 0.10.0
libtpu: 0.0.40
codegen_flags: <defaults>
</compile_context>

<pallas_src>
import jax
import jax.numpy as jnp
from jax.experimental import pallas as pl
from jax.experimental.pallas import tpu as pltpu


def res_multi_conv_kernel(x_ref, wcat_t_ref, bias_ref, wr_t_ref, out_ref):
    """One grid step == B batch elements, all math in native (channels, length).

    x_ref      : (B, C, L)    unpadded input block (halo handled in-kernel)
    wcat_t_ref : (2C, 5C)     [conv3 ; conv5] im2col weights, residual identity
                              and BN scale already folded in (transposed)
    bias_ref   : (3C, 1)      rows 0..2C-1: folded BN/conv bias,
                              rows 2C..3C-1: reduce-conv bias
    wr_t_ref   : (C, 2C)      1x1 reduce-conv weights (transposed)
    out_ref    : (1, C, B*L)  lane-dense output slab (batch concatenated on lanes)
    """
    B, C, L = x_ref.shape
    BL = B * L

    # Lane-concatenate the B batch elements: xt[c, b*L + l] = x[b, c, l].
    xt = jnp.concatenate([x_ref[b] for b in range(B)], axis=-1)          # (C, BL)

    # Lane position inside its batch segment (for halo / batch-seam masking).
    lane = jax.lax.broadcasted_iota(jnp.int32, (C, BL), 1)
    if (L & (L - 1)) == 0:
        pos = lane & (L - 1)
    else:
        pos = lane % L

    # Transposed im2col: 5 shifted length-L windows stacked along sublanes.
    # Shifts are XLU lane rotations with the out-of-range lanes zeroed, so no
    # padded copy of x ever exists (neither in HBM nor in VMEM).
    parts = []
    for k in range(5):
        d = k - 2
        if d == 0:
            parts.append(xt)
        else:
            rolled = pltpu.roll(xt, shift=(-d) % BL, axis=1)   # rolled[p] = xt[p + d]
            valid = (pos >= -d) if d < 0 else (pos < L - d)
            parts.append(jnp.where(valid, rolled, 0.0))
    patches_t = jnp.concatenate(parts, axis=0)                           # (5C, BL)

    bias = bias_ref[...]                                                 # (3C, 1)
    b_cat = bias[: 2 * C, :]                                             # (2C, 1)
    b_red = bias[2 * C:, :]                                              # (C, 1)

    # conv3 || conv5 (+residual, +BN scale), all in ONE MXU matmul, f32 acc.
    pre = jnp.dot(wcat_t_ref[...], patches_t,
                  preferred_element_type=jnp.float32)                    # (2C, BL)
    y = jnp.maximum(pre + b_cat, 0.0)                                    # BN bias + ReLU

    # 1x1 reduce conv as a second matmul.
    out = jnp.dot(wr_t_ref[...], y,
                  preferred_element_type=jnp.float32) + b_red            # (C, BL)
    out_ref[0] = out.astype(out_ref.dtype)


def _pick_batch_block(n, l, target_lanes=512):
    """Largest divisor of n keeping ~target_lanes lanes per step (B*L)."""
    cap = max(1, min(n, target_lanes // max(l, 1)))
    b = 1
    for d in range(1, cap + 1):
        if n % d == 0:
            b = d
    return b


@jax.jit
def res_multi_conv_forward(x, w3, b3, w5, b5, gamma, beta, mean, var, wr, br):
    """x: (N, C, L) float32 (PyTorch NCL layout). Returns (N, C, L)."""
    eps = 1e-5
    N, C, L = x.shape
    B = _pick_batch_block(N, L)    # note: keep G = N // B >= 2 if you want both
    G = N // B                     # v7x TensorCores busy for very small N.
    BL = B * L

    # ---- weight / BN folding (tiny; constant-folded under jit — hoist & cache
    # if weights are static and this is called many times). ----
    # Combined im2col weight with conv3 zero-padded to 5 taps.
    w3p = jnp.pad(w3, ((0, 0), (0, 0), (1, 1)))                    # (C, C, 5)
    wcat = jnp.concatenate([w3p, w5], axis=0)                      # (2C, C, 5)
    # Fold the residual: conv(x) + x == (W + I at centre tap) @ patches.
    eye = jnp.eye(C, dtype=x.dtype)
    wcat = wcat.at[:C, :, 2].add(eye).at[C:, :, 2].add(eye)
    # Transposed im2col layout: wcat_t[o, k*C + i] = wcat[o, i, k].
    wcat_t = jnp.transpose(wcat, (0, 2, 1)).reshape(2 * C, 5 * C)
    # Fold the BatchNorm (eval) scale into the matmul weights.
    s = gamma * jax.lax.rsqrt(var + eps)                           # (2C,)
    wcat_t = wcat_t * s[:, None]
    # Folded per-channel biases (BN shift + conv bias) and the reduce-conv bias
    # merged into one small operand.
    bias_cat = jnp.concatenate([b3, b5])                           # (2C,)
    b_eff = beta - mean * s + bias_cat * s                         # (2C,)
    bias_all = jnp.concatenate([b_eff, br]).reshape(3 * C, 1)      # (3C, 1)

    wr_t = wr[:, :, 0]                                             # (C, 2C)

    out_slab = pl.pallas_call(
        res_multi_conv_kernel,
        out_shape=jax.ShapeDtypeStruct((G, C, BL), jnp.float32),
        grid_spec=pltpu.PrefetchScalarGridSpec(
            num_scalar_prefetch=0,
            grid=(G,),
            in_specs=[
                pl.BlockSpec((B, C, L), lambda g: (g, 0, 0)),
                pl.BlockSpec((2 * C, 5 * C), lambda g: (0, 0)),
                pl.BlockSpec((3 * C, 1), lambda g: (0, 0)),
                pl.BlockSpec((C, 2 * C), lambda g: (0, 0)),
            ],
            out_specs=pl.BlockSpec((1, C, BL), lambda g: (g, 0, 0)),
        ),
        compiler_params=pltpu.CompilerParams(
            dimension_semantics=("parallel",)),   # v7x: shard batch groups over TCs
    )(x, wcat_t, bias_all, wr_t)

    # Layout plumbing only: (G, C, B*L) lane-dense slab -> (N, C, L).
    return (out_slab.reshape(G, C, B, L)
            .transpose(0, 2, 1, 3)
            .reshape(N, C, L))


def reference_forward(x, w3, b3, w5, b5, gamma, beta, mean, var, wr, br):
    """Pure-JAX (XLA) reference matching the PyTorch forward (BN eval mode)."""
    eps = 1e-5
    dn = ("NCH", "OIH", "NCH")
    x3 = jax.lax.conv_general_dilated(x, w3, (1,), ((1, 1),),
                                      dimension_numbers=dn) + b3[None, :, None] + x
    x5 = jax.lax.conv_general_dilated(x, w5, (1,), ((2, 2),),
                                      dimension_numbers=dn) + b5[None, :, None] + x
    z = jnp.concatenate([x3, x5], axis=1)
    s = gamma * jax.lax.rsqrt(var + eps)
    z = (z - mean[None, :, None]) * s[None, :, None] + beta[None, :, None]
    z = jnp.maximum(z, 0.0)
    out = jax.lax.conv_general_dilated(z, wr, (1,), ((0, 0),),
                                       dimension_numbers=dn) + br[None, :, None]
    return out


if __name__ == "__main__":
    # Small shapes consistent with the module: channels=16 (module default),
    # batch=2, sequence length 64.  Input is PyTorch-style (N, C, L).
    N, C, L = 2, 16, 64

    key = jax.random.PRNGKey(0)
    keys = jax.random.split(key, 10)

    x = jax.random.normal(keys[0], (N, C, L), jnp.float32)

    def conv_init(kw, kb, shape):
        fan_in = shape[1] * shape[2]
        bound = 1.0 / (fan_in ** 0.5)
        w = jax.random.uniform(kw, shape, jnp.float32, minval=-bound, maxval=bound)
        b = jax.random.uniform(kb, (shape[0],), jnp.float32, minval=-bound, maxval=bound)
        return w, b

    w3, b3 = conv_init(keys[1], keys[2], (C, C, 3))        # Conv1d k=3, pad=1
    w5, b5 = conv_init(keys[3], keys[4], (C, C, 5))        # Conv1d k=5, pad=2
    wr, br = conv_init(keys[5], keys[6], (C, 2 * C, 1))    # Conv1d k=1, 2C->C

    # BatchNorm1d(2C) eval-mode parameters (non-trivial to exercise the fold).
    gamma = jax.random.uniform(keys[7], (2 * C,), jnp.float32, minval=0.5, maxval=1.5)
    beta = 0.1 * jax.random.normal(keys[8], (2 * C,), jnp.float32)
    mean = 0.1 * jax.random.normal(keys[9], (2 * C,), jnp.float32)
    var = jnp.linspace(0.5, 1.5, 2 * C).astype(jnp.float32)

    out = res_multi_conv_forward(x, w3, b3, w5, b5, gamma, beta, mean, var, wr, br)
    out = jax.block_until_ready(out)

    ref = reference_forward(x, w3, b3, w5, b5, gamma, beta, mean, var, wr, br)
    assert out.shape == (N, C, L), out.shape
    max_err = float(jnp.max(jnp.abs(out - ref)))
    assert jnp.allclose(out, ref, rtol=1e-4, atol=1e-4), f"mismatch vs reference: {max_err}"

    print("KERNEL_OK")
</pallas_src>

<mosaic_0001>
module attributes {stable_mosaic.version = 11 : i64} {
  func.func @res_multi_conv_kernel(%arg0: i32, %arg1: memref<2x16x64xf32, #tpu.memory_space<vmem>>, %arg2: memref<32x80xf32, #tpu.memory_space<vmem>>, %arg3: memref<48x1xf32, #tpu.memory_space<vmem>>, %arg4: memref<16x32xf32, #tpu.memory_space<vmem>>, %arg5: memref<1x16x128xf32, #tpu.memory_space<vmem>>) attributes {dimension_semantics = [#tpu.dimension_semantics<parallel>], iteration_bounds = array<i64: 1>, scalar_prefetch = 0 : i64, scratch_operands = 0 : i64, tpu.core_type = #tpu.core_type<tc>, window_params = [{transform_indices = @transform_0, window_bounds = array<i64: 2, 16, 64>}, {pipeline_mode = #tpu.pipeline_mode<synchronous>, transform_indices = @transform_1, window_bounds = array<i64: 32, 80>}, {pipeline_mode = #tpu.pipeline_mode<synchronous>, transform_indices = @transform_2, window_bounds = array<i64: 48, 1>}, {pipeline_mode = #tpu.pipeline_mode<synchronous>, transform_indices = @transform_3, window_bounds = array<i64: 16, 32>}, {transform_indices = @transform_4, window_bounds = array<i64: 1, 16, 128>}]} {
    %c0 = arith.constant 0 : index
    %c0_0 = arith.constant 0 : index
    %c0_1 = arith.constant 0 : index
    %0 = vector.load %arg1[%c0, %c0_0, %c0_1] : memref<2x16x64xf32, #tpu.memory_space<vmem>>, vector<1x16x64xf32>
    %1 = vector.shape_cast %0 : vector<1x16x64xf32> to vector<16x64xf32>
    %c1 = arith.constant 1 : index
    %c0_2 = arith.constant 0 : index
    %c0_3 = arith.constant 0 : index
    %2 = vector.load %arg1[%c1, %c0_2, %c0_3] : memref<2x16x64xf32, #tpu.memory_space<vmem>>, vector<1x16x64xf32>
    %3 = vector.shape_cast %2 : vector<1x16x64xf32> to vector<16x64xf32>
    %4 = tpu.concatenate %1, %3 in 1 : vector<16x64xf32>, vector<16x64xf32> -> vector<16x128xf32>
    %5 = tpu.iota {dimensions = array<i32: 1>} : vector<16x128xi32>
    %c63_i32 = arith.constant 63 : i32
    %6 = vector.broadcast %c63_i32 : i32 to vector<16x128xi32>
    %7 = arith.andi %5, %6 : vector<16x128xi32>
    %c2_i32 = arith.constant 2 : i32
    %8 = tpu.dynamic_rotate %4 by %c2_i32 dim 1 : vector<16x128xf32>, i32 -> vector<16x128xf32>
    %c2_i32_4 = arith.constant 2 : i32
    %9 = vector.broadcast %c2_i32_4 : i32 to vector<16x128xi32>
    %10 = arith.cmpi sge, %7, %9 : vector<16x128xi32>
    %cst = arith.constant 0.000000e+00 : f32
    %11 = vector.broadcast %cst : f32 to vector<16x128xf32>
    %12 = arith.select %10, %8, %11 : vector<16x128xi1>, vector<16x128xf32>
    %c1_i32 = arith.constant 1 : i32
    %13 = tpu.dynamic_rotate %4 by %c1_i32 dim 1 : vector<16x128xf32>, i32 -> vector<16x128xf32>
    %c1_i32_5 = arith.constant 1 : i32
    %14 = vector.broadcast %c1_i32_5 : i32 to vector<16x128xi32>
    %15 = arith.cmpi sge, %7, %14 : vector<16x128xi32>
    %cst_6 = arith.constant 0.000000e+00 : f32
    %16 = vector.broadcast %cst_6 : f32 to vector<16x128xf32>
    %17 = arith.select %15, %13, %16 : vector<16x128xi1>, vector<16x128xf32>
    %c127_i32 = arith.constant 127 : i32
    %18 = tpu.dynamic_rotate %4 by %c127_i32 dim 1 : vector<16x128xf32>, i32 -> vector<16x128xf32>
    %c63_i32_7 = arith.constant 63 : i32
    %19 = vector.broadcast %c63_i32_7 : i32 to vector<16x128xi32>
    %20 = arith.cmpi slt, %7, %19 : vector<16x128xi32>
    %cst_8 = arith.constant 0.000000e+00 : f32
    %21 = vector.broadcast %cst_8 : f32 to vector<16x128xf32>
    %22 = arith.select %20, %18, %21 : vector<16x128xi1>, vector<16x128xf32>
    %c126_i32 = arith.constant 126 : i32
    %23 = tpu.dynamic_rotate %4 by %c126_i32 dim 1 : vector<16x128xf32>, i32 -> vector<16x128xf32>
    %c62_i32 = arith.constant 62 : i32
    %24 = vector.broadcast %c62_i32 : i32 to vector<16x128xi32>
    %25 = arith.cmpi slt, %7, %24 : vector<16x128xi32>
    %cst_9 = arith.constant 0.000000e+00 : f32
    %26 = vector.broadcast %cst_9 : f32 to vector<16x128xf32>
    %27 = arith.select %25, %23, %26 : vector<16x128xi1>, vector<16x128xf32>
    %28 = tpu.concatenate %12, %17, %4, %22, %27 in 0 : vector<16x128xf32>, vector<16x128xf32>, vector<16x128xf32>, vector<16x128xf32>, vector<16x128xf32> -> vector<80x128xf32>
    %c0_10 = arith.constant 0 : index
    %c0_11 = arith.constant 0 : index
    %29 = vector.load %arg3[%c0_10, %c0_11] : memref<48x1xf32, #tpu.memory_space<vmem>>, vector<48x1xf32>
    %30 = vector.extract_strided_slice %29 {offsets = [0, 0], sizes = [32, 1], strides = [1, 1]} : vector<48x1xf32> to vector<32x1xf32>
    %31 = vector.extract_strided_slice %29 {offsets = [32, 0], sizes = [16, 1], strides = [1, 1]} : vector<48x1xf32> to vector<16x1xf32>
    %c0_12 = arith.constant 0 : index
    %c0_13 = arith.constant 0 : index
    %32 = vector.load %arg2[%c0_12, %c0_13] : memref<32x80xf32, #tpu.memory_space<vmem>>, vector<32x80xf32>
    %cst_14 = arith.constant dense<0.000000e+00> : vector<32x128xf32>
    %33 = tpu.matmul %32, %28, %cst_14 {dimension_numbers = #tpu.dot_dimension_numbers<[1], [0], [0], [1], [0, 0, 1, 1], [], []>} : vector<32x80xf32>, vector<80x128xf32>, vector<32x128xf32> -> vector<32x128xf32>
    %34 = vector.broadcast %30 : vector<32x1xf32> to vector<32x128xf32>
    %35 = arith.addf %33, %34 : vector<32x128xf32>
    %cst_15 = arith.constant 0.000000e+00 : f32
    %36 = vector.broadcast %cst_15 : f32 to vector<32x128xf32>
    %37 = arith.maximumf %35, %36 : vector<32x128xf32>
    %c0_16 = arith.constant 0 : index
    %c0_17 = arith.constant 0 : index
    %38 = vector.load %arg4[%c0_16, %c0_17] : memref<16x32xf32, #tpu.memory_space<vmem>>, vector<16x32xf32>
    %cst_18 = arith.constant dense<0.000000e+00> : vector<16x128xf32>
    %39 = tpu.matmul %38, %37, %cst_18 {dimension_numbers = #tpu.dot_dimension_numbers<[1], [0], [0], [1], [0, 0, 1, 1], [], []>} : vector<16x32xf32>, vector<32x128xf32>, vector<16x128xf32> -> vector<16x128xf32>
    %40 = vector.broadcast %31 : vector<16x1xf32> to vector<16x128xf32>
    %41 = arith.addf %39, %40 : vector<16x128xf32>
    %c0_19 = arith.constant 0 : index
    %c0_20 = arith.constant 0 : index
    %c0_21 = arith.constant 0 : index
    %42 = vector.load %arg5[%c0_19, %c0_20, %c0_21] : memref<1x16x128xf32, #tpu.memory_space<vmem>>, vector<1x16x128xf32>
    %43 = vector.shape_cast %42 : vector<1x16x128xf32> to vector<16x128xf32>
    %44 = vector.shape_cast %41 : vector<16x128xf32> to vector<1x16x128xf32>
    tpu.vector_store %arg5[%c0_19, %c0_20, %c0_21], %44 {strides = array<i32>} : memref<1x16x128xf32, #tpu.memory_space<vmem>>, vector<1x16x128xf32>,
    return
  }
  func.func @transform_0(%arg0: i32) -> (i32, i32, i32) {
    %c0_i32 = arith.constant 0 : i32
    %c0_i32_0 = arith.constant 0 : i32
    %c0_i32_1 = arith.constant 0 : i32
    return %arg0, %c0_i32, %c0_i32_0 : i32, i32, i32
  }
  func.func @transform_1(%arg0: i32) -> (i32, i32) {
    %c0_i32 = arith.constant 0 : i32
    %c0_i32_0 = arith.constant 0 : i32
    %c0_i32_1 = arith.constant 0 : i32
    return %c0_i32, %c0_i32_0 : i32, i32
  }
  func.func @transform_2(%arg0: i32) -> (i32, i32) {
    %c0_i32 = arith.constant 0 : i32
    %c0_i32_0 = arith.constant 0 : i32
    %c0_i32_1 = arith.constant 0 : i32
    return %c0_i32, %c0_i32_0 : i32, i32
  }
  func.func @transform_3(%arg0: i32) -> (i32, i32) {
    %c0_i32 = arith.constant 0 : i32
    %c0_i32_0 = arith.constant 0 : i32
    %c0_i32_1 = arith.constant 0 : i32
    return %c0_i32, %c0_i32_0 : i32, i32
  }
  func.func @transform_4(%arg0: i32) -> (i32, i32, i32) {
    %c0_i32 = arith.constant 0 : i32
    %c0_i32_0 = arith.constant 0 : i32
    %c0_i32_1 = arith.constant 0 : i32
    return %arg0, %c0_i32, %c0_i32_0 : i32, i32, i32
  }
}

</mosaic_0001>

<bundles_post_ra>
// kernel: res_multi_conv_forward.1
= control target key start
LH: loop header
LB: loop body
LE: loop exit
PB: predicated region body
PF: predicated region fallthrough
CT: control target
= control target key end

     0   :  { %s233_s17 = smov 64   ;;  %vm30_vm0 = vcmask 523264   ;;  %s234_s22 = smov 1   ;;  %v33_v8 = vlaneseq  ;;  %v238_v12 = vmov 0   ;;  %vm94_vm5 = vcmask 654336   ;;  %s348_s0 = inlined_call_operand.vmem [shape: f32[2,16,64], index: 0, kind: input, shape index: {}]   ;;  %s349_s2 = inlined_call_operand.vmem [shape: f32[48,1], index: 2, kind: input, shape index: {}]   ;;  %s350_s1 = inlined_call_operand.vmem [shape: f32[32,80], index: 1, kind: input, shape index: {}]   ;;  %s351_s3 = inlined_call_operand.vmem [shape: f32[16,32], index: 3, kind: input, shape index: {}]   ;;  %s352_s4 = inlined_call_operand.vmem [shape: f32[1,16,128], index: 4, kind: output, shape index: {}]  }
   0x1   :  { %v189_v0 = vld [vmem:[%s348_s0 + $0x18] sm:$0xff]  ;;  %v188_v1 = vld [vmem:[%s348_s0 + $0x10] sm:$0xff]  ;;  %v18_v2 = vld [vmem:[%s348_s0 + $0x8] sm:$0xff]  ;;  %s235_s23 = smov 127   ;;  %s236_s24 = smov 126   ;;  %230 = vset.pattern.permute.xlu1 %v238_v12  ;;  %232 = vset.pattern.permute.xlu0 %v238_v12  ;;  %vm152_vm6 = vcmask 261120  }
   0x2   :  { %26 = vrot.lane.b32.xlu0 %v189_v0, %s233_s17  ;;  %v17_v5 = vld [vmem:[%s348_s0] sm:$0xff]  ;;  %s237_s27 = smov 2   ;;  %v34_v9 = vand.u32 127, %v33_v8  ;;  %v67_v11 = vld [vmem:[%s349_s2 + $0x18] sm:$0xff]  ;;  %231 = vset.pattern.permute.xlu2 %v238_v12  ;;  %v65_v16 = vld [vmem:[%s349_s2 + $0x8] sm:$0xff] }
   0x3   :  { %v64_v15 = vld [vmem:[%s349_s2] sm:$0xff]  ;;  %v66_v17 = vld [vmem:[%s349_s2 + $0x10] sm:$0xff]  ;;  %v69_v19 = vld [vmem:[%s349_s2 + $0x28] sm:$0xff] }
   0x4   :  { %v276_v10 = vand.u32 63, %v34_v9  ;;  %v68_v21 = vld [vmem:[%s349_s2 + $0x20] sm:$0xff]  ;;  %v72_v27 = vld [vmem:[%s350_s1 + $0x10] sm:$0xff]  ;;  %v71_v28 = vld [vmem:[%s350_s1 + $0x8] sm:$0xff] }
   0x5   :  { %v70_v25 = vld [vmem:[%s350_s1] sm:$0xff]  ;;  %v73_v29 = vld [vmem:[%s350_s1 + $0x18] sm:$0xff]  ;;  %v141_v47 = vld [vmem:[%s351_s3 + $0x8] sm:$0xff] }
   0x6   :  { %vm61_vm1 = vcmp.lt.s32.totalorder %v276_v10, 62  ;;  %vm54_vm2 = vcmp.lt.s32.totalorder %v276_v10, 63  ;;  %vm47_vm3 = vcmp.ge.s32.totalorder %v276_v10, 1  ;;  %vm40_vm4 = vcmp.ge.s32.totalorder %v276_v10, 2  ;;  %v140_v46 = vld [vmem:[%s351_s3] sm:$0xff] }
   0xa   :  { %24 = vrot.lane.b32.xlu0 %v188_v1, %s233_s17 }
  0x74   :  { %v27_v3 = vpop.permute.xlu0 %26 }
  0x75   :  { %v32_v4 = vsel %vm30_vm0, %v18_v2, %v27_v3 }
  0x76   :  { %45 = vrot.lane.b32.xlu0 %v32_v4, %s234_s22  ;;  %52 = vrot.lane.b32.xlu2 %v32_v4, %s235_s23 }
  0x77   :  { %59 = vrot.lane.b32.xlu1 %v32_v4, %s236_s24 }
  0x7c   :  { %v25_v6 = vpop.permute.xlu0 %24 }
  0x7d   :  { %v31_v7 = vsel %vm30_vm0, %v17_v5, %v25_v6 }
  0x7e   :  { %36 = vrot.lane.b32.xlu0 %v31_v7, %s237_s27  ;;  %50 = vrot.lane.b32.xlu2 %v31_v7, %s235_s23 }
  0x7f   :  { %57 = vrot.lane.b32.xlu1 %v31_v7, %s236_s24 }
  0x86   :  { %38 = vrot.lane.b32.xlu2 %v32_v4, %s237_s27  ;;  %81 = vperm.xlu0 %232, %v65_v16  }
  0x87   :  { %43 = vrot.lane.b32.xlu1 %v31_v7, %s234_s22 }
  0x8e   :  { %86 = vperm.xlu2 %231, %v66_v17  }
  0x8f   :  { %91 = vperm.xlu1 %230, %v67_v11  }
  0x96   :  { %144 = vperm.xlu2 %231, %v68_v21  }
  0x97   :  { %76 = vperm.xlu1 %230, %v64_v15  }
  0x9f   :  { %149 = vperm.xlu1 %230, %v69_v19  }
  0xd0   :  { %v53_v14 = vpop.permute.xlu2 %52 }
  0xd8   :  { %v51_v20 = vpop.permute.xlu2 %50 }
  0xe0   :  { %v39_v24 = vpop.permute.xlu2 %38 }
  0xe8   :  { %v46_v22 = vpop.permute.xlu0 %45  ;;  %v87_v32 = vpop.permute.xlu2 %86 }
  0xe9   :  { %v60_v13 = vpop.permute.xlu1 %59 }
  0xea   :  { %190 = vmatpush.msk.msra.mxu0 %vm61_vm1, %v60_v13  ;;  %204 = vmatpush.msk.msra.mxu2 %vm61_vm1, %v60_v13 }
  0xeb   :  { %205 = vmatpush.msk.msra.mxu3 %vm61_vm1, %v60_v13 }
  0xf0   :  { %v37_v26 = vpop.permute.xlu0 %36  ;;  %v145_v48 = vpop.permute.xlu2 %144 }
  0xf1   :  { %v58_v18 = vpop.permute.xlu1 %57 }
  0xf2   :  { %191 = vmatpush.msk.msra.mxu0 %vm61_vm1, %v58_v18  ;;  %206 = vmatpush.msk.msra.mxu2 %vm61_vm1, %v58_v18 }
  0xf3   :  { %207 = vmatpush.msk.msra.mxu3 %vm61_vm1, %v58_v18 }
  0xf4   :  { %192 = vmatpush.msk.msra.mxu0 %vm54_vm2, %v53_v14  ;;  %208 = vmatpush.msk.msra.mxu2 %vm54_vm2, %v53_v14 }
  0xf5   :  { %209 = vmatpush.msk.msra.mxu3 %vm54_vm2, %v53_v14 }
  0xf6   :  { %193 = vmatpush.msk.msra.mxu0 %vm54_vm2, %v51_v20  ;;  %210 = vmatpush.msk.msra.mxu2 %vm54_vm2, %v51_v20 }
  0xf7   :  { %211 = vmatpush.msk.msra.mxu3 %vm54_vm2, %v51_v20 }
  0xf8   :  { %117 = vmatpush.msra.mxu0 %v32_v4  ;;  %212 = vmatpush.msra.mxu2 %v32_v4  ;;  %v82_v33 = vpop.permute.xlu0 %81 }
  0xf9   :  { %213 = vmatpush.msra.mxu3 %v32_v4  ;;  %v44_v23 = vpop.permute.xlu1 %43 }
  0xfa   :  { %118 = vmatpush.msra.mxu0 %v31_v7  ;;  %214 = vmatpush.msra.mxu2 %v31_v7 }
  0xfb   :  { %215 = vmatpush.msra.mxu3 %v31_v7 }
  0xfc   :  { %194 = vmatpush.msk.msra.mxu0 %vm47_vm3, %v46_v22  ;;  %216 = vmatpush.msk.msra.mxu2 %vm47_vm3, %v46_v22 }
  0xfd   :  { %217 = vmatpush.msk.msra.mxu3 %vm47_vm3, %v46_v22 }
  0xfe   :  { %195 = vmatpush.msk.msra.mxu0 %vm47_vm3, %v44_v23  ;;  %218 = vmatpush.msk.msra.mxu2 %vm47_vm3, %v44_v23 }
  0xff   :  { %219 = vmatpush.msk.msra.mxu3 %vm47_vm3, %v44_v23 }
 0x100   :  { %196 = vmatpush.msk.msra.mxu0 %vm40_vm4, %v39_v24  ;;  %220 = vmatpush.msk.msra.mxu2 %vm40_vm4, %v39_v24 }
 0x101   :  { %221 = vmatpush.msk.msra.mxu3 %vm40_vm4, %v39_v24  ;;  %v92_v31 = vpop.permute.xlu1 %91 }
 0x102   :  { %197 = vmatpush.msk.msra.mxu0 %vm40_vm4, %v37_v26  ;;  %222 = vmatpush.msk.msra.mxu2 %vm40_vm4, %v37_v26 }
 0x103   :  { %223 = vmatpush.msk.msra.mxu3 %vm40_vm4, %v37_v26  ;;  %198 = vmatmul.msk.f32.vlgmr.msra.gmra.mxu0 %vm94_vm5, %v70_v25 }
 0x104   :  { %200 = vmatmul.msk.f32.vlgmr.msra.gmra.mxu3 %vm94_vm5, %v72_v27  ;;  %199 = vmatmul.msk.f32.vlgmr.msra.gmra.mxu2 %vm94_vm5, %v71_v28 }
 0x109   :  { %v77_v41 = vpop.permute.xlu1 %76 }
 0x10c   :  { %201 = vmatmul.msk.f32.gmra.mxu3 %vm94_vm5, %v73_v29 }
 0x111   :  { %v150_v51 = vpop.permute.xlu1 %149 }
 0x180   :  { %v124_v39 = vpop.f32.mrf.mxu0 }
 0x181   :  { %v125_v43 = vadd.f32 %v124_v39, %v77_v41 }
 0x183   :  { %v136_v45 = vmax.f32 %v125_v43, 0.0 }
 0x187   :  { %v130_v30 = vpop.f32.mrf.mxu3  ;;  %v127_v34 = vpop.f32.mrf.mxu2 }
 0x188   :  { %v131_v36 = vadd.f32 %v130_v30, %v87_v32  ;;  %v128_v37 = vadd.f32 %v127_v34, %v82_v33 }
 0x18a   :  { %v138_v42 = vmax.f32 %v131_v36, 0.0  ;;  %v137_v44 = vmax.f32 %v128_v37, 0.0 }
 0x18f   :  { %v133_v35 = vpop.f32.mrf.mxu3 }
 0x190   :  { %v134_v38 = vadd.f32 %v133_v35, %v92_v31 }
 0x192   :  { %v139_v40 = vmax.f32 %v134_v38, 0.0 }
 0x194   :  { %171 = vmatpush.msra.mxu1 %v139_v40 }
 0x196   :  { %172 = vmatpush.msra.mxu1 %v138_v42 }
 0x198   :  { %173 = vmatpush.msra.mxu1 %v137_v44 }
 0x19a   :  { %174 = vmatpush.msra.mxu1 %v136_v45 }
 0x19b   :  { %202 = vmatmul.msk.f32.vlgmr.msra.gmra.mxu1 %vm152_vm6, %v140_v46 }
 0x1a3   :  { %203 = vmatmul.msk.f32.gmra.mxu1 %vm152_vm6, %v141_v47 }
 0x218   :  { %v176_v49 = vpop.f32.mrf.mxu1 }
 0x219   :  { %v177_v50 = vadd.f32 %v176_v49, %v145_v48 }
 0x21b   :  { %182 = vst [vmem:[%s352_s4] sm:$0xff] %v177_v50 }
 0x220   :  { %v179_v52 = vpop.f32.mrf.mxu1 }
 0x221   :  { %v180_v53 = vadd.f32 %v179_v52, %v150_v51 }
 0x223   :  { %183 = vst [vmem:[%s352_s4 + $0x8] sm:$0xff] %v180_v53 }

</bundles_post_ra>
